<compile_context>
chip_gen: v6e
topology: v6e:2x2x1
jax: 0.10.0
libtpu: 0.0.40
codegen_flags: <defaults>
</compile_context>

<pallas_src>
import functools

import jax
import jax.numpy as jnp
from jax.experimental import pallas as pl
from jax.experimental.pallas import tpu as pltpu


_VMEM_LIMIT = 48 * 1024 * 1024       # safe on v7x (64 MiB phys) and v5e/v6e (128 MiB)
_RESIDENT_CAP = 8 * 1024 * 1024      # per-array cap for VMEM-resident XW / Z panels


def _round_up(x, m):
    return (x + m - 1) // m * m


def _choose_tiles(n):
    """Node-axis padding & tiles.

    Large n: tm=512 / tk=1024 and n padded to a multiple of 1024 so the row
    ('parallel') axis has an even block count >= 2 (both v7x TensorCores busy).
    Small n: a single lane-dense tile (no 128-tile fallback, no grid overhead).
    """
    if n <= 512:
        n_pad = _round_up(max(n, 1), 128)
        return n_pad, n_pad, n_pad
    n_pad = _round_up(n, 1024)
    return n_pad, 512, 1024


# ---------------------------------------------------------------------------
# Kernel 0:  XW = (X @ W1) * D_out^{-1/2}        (hoisted feature transform)
# ---------------------------------------------------------------------------
def _xw_kernel(x_ref, w1_ref, dout_ref, xw_ref):
    xw = jnp.dot(x_ref[...], w1_ref[...], preferred_element_type=jnp.float32)
    xw_ref[...] = (xw * dout_ref[...]).astype(xw_ref.dtype)


# ---------------------------------------------------------------------------
# Kernel 1:  Z = D_out^{-1/2} * relu(D_in^{-1/2} * (A @ XW) + b1) @ (W2 @ Wfc)
# Grid: (row blocks [parallel], neighbor-reduction blocks [arbitrary]).
# A is int8 (exact 0/1 counts), upcast to bf16 on the VPU before the MXU dot.
# ---------------------------------------------------------------------------
def _conv1_kernel(a_ref, xw_ref, din_ref, dout_ref, b1_ref, w2fc_ref,
                  z_ref, acc_ref, *, tk, resident):
    k = pl.program_id(1)

    @pl.when(k == 0)
    def _():
        acc_ref[...] = jnp.zeros_like(acc_ref)

    if resident:
        xw = xw_ref[pl.ds(pl.multiple_of(k * tk, tk), tk), :]
    else:
        xw = xw_ref[...]
    acc_ref[...] += jnp.dot(a_ref[...].astype(jnp.bfloat16), xw,
                            preferred_element_type=jnp.float32)

    @pl.when(k == pl.num_programs(1) - 1)
    def _():
        # Exact normalization: D_in^{-1/2} applied post-aggregation in f32.
        h = jnp.maximum(acc_ref[...] * din_ref[...] + b1_ref[...], 0.0)
        z = jnp.dot(h.astype(jnp.bfloat16), w2fc_ref[...],
                    preferred_element_type=jnp.float32)
        # Pre-scale rows by D_out^{-1/2} for the second aggregation pass.
        z_ref[...] = (z * dout_ref[...]).astype(z_ref.dtype)


# ---------------------------------------------------------------------------
# Kernel 2:  OUT = D_in^{-1/2} * (A @ Z) + (b2 @ Wfc + bfc)
# ---------------------------------------------------------------------------
def _conv2_kernel(a_ref, z_ref, din_ref, b_ref, o_ref, acc_ref, *, tk, resident):
    k = pl.program_id(1)

    @pl.when(k == 0)
    def _():
        acc_ref[...] = jnp.zeros_like(acc_ref)

    if resident:
        zb = z_ref[pl.ds(pl.multiple_of(k * tk, tk), tk), :]
    else:
        zb = z_ref[...]
    acc_ref[...] += jnp.dot(a_ref[...].astype(jnp.bfloat16), zb,
                            preferred_element_type=jnp.float32)

    @pl.when(k == pl.num_programs(1) - 1)
    def _():
        o_ref[...] = (acc_ref[...] * din_ref[...] + b_ref[...]).astype(o_ref.dtype)


def gnn_forward(a, d_in_isqrt, d_out_isqrt, x, w1, b1, w2, b2, wfc, bfc):
    """a: (n, n) int8 raw adjacency counts; d_*_isqrt: (n,) f32 clamped-degree^-1/2."""
    n, in_feats = x.shape
    hidden = w1.shape[1]
    out_dim = wfc.shape[1]

    # ---- Fold trailing nn.Linear into GraphConv-2 (parameter-only) ----
    w2fc = jnp.dot(w2, wfc, preferred_element_type=jnp.float32)          # (hidden, out)
    b2fc = jnp.dot(b2, wfc, preferred_element_type=jnp.float32) + bfc    # (1, out)

    # ---- Lane-dense zero padding ----
    n_pad, tm, tk = _choose_tiles(n)
    f_pad = _round_up(in_feats, 128)
    h_pad = _round_up(hidden, 128)
    o_pad = _round_up(out_dim, 128)
    grid = (n_pad // tm, n_pad // tk)
    multi_step = grid[0] * grid[1] > 2

    def pad2(arr, rows, cols, dtype):
        buf = jnp.zeros((rows, cols), dtype)
        return buf.at[:arr.shape[0], :arr.shape[1]].set(arr.astype(dtype))

    a_i8 = pad2(a, n_pad, n_pad, jnp.int8)            # exact small counts
    x_bf = pad2(x, n_pad, f_pad, jnp.bfloat16)
    w1_bf = pad2(w1, f_pad, h_pad, jnp.bfloat16)
    b1_f = pad2(b1, 1, h_pad, jnp.float32)
    w2fc_bf = pad2(w2fc, h_pad, o_pad, jnp.bfloat16)
    b2fc_f = pad2(b2fc, 1, o_pad, jnp.float32)
    din_f = pad2(d_in_isqrt[:, None], n_pad, 1, jnp.float32)
    dout_f = pad2(d_out_isqrt[:, None], n_pad, 1, jnp.float32)

    def a_spec():
        kwargs = {}
        if multi_step:
            # Deeper buffering on the sole large streamed operand of an
            # HBM-bound loop; skipped for trivially small grids.
            kwargs["pipeline_mode"] = pl.Buffered(3)
        return pl.BlockSpec((tm, tk), lambda i, k: (i, k), **kwargs)

    cparams = pltpu.CompilerParams(
        dimension_semantics=("parallel", "arbitrary"),
        vmem_limit_bytes=_VMEM_LIMIT,
    )

    # ---- Kernel 0: hoisted feature transform ----
    cost0 = pl.CostEstimate(
        flops=2 * n_pad * f_pad * h_pad,
        transcendentals=0,
        bytes_accessed=2 * (n_pad * f_pad + f_pad * h_pad + n_pad * h_pad) + 4 * n_pad,
    )
    xw = pl.pallas_call(
        _xw_kernel,
        out_shape=jax.ShapeDtypeStruct((n_pad, h_pad), jnp.bfloat16),
        grid_spec=pltpu.PrefetchScalarGridSpec(
            num_scalar_prefetch=0,
            grid=(n_pad // tm,),
            in_specs=[
                pl.BlockSpec((tm, f_pad), lambda i: (i, 0)),        # X
                pl.BlockSpec((f_pad, h_pad), lambda i: (0, 0)),     # W1
                pl.BlockSpec((tm, 1), lambda i: (i, 0)),            # D_out^{-1/2}
            ],
            out_specs=pl.BlockSpec((tm, h_pad), lambda i: (i, 0)),
        ),
        compiler_params=pltpu.CompilerParams(
            dimension_semantics=("parallel",), vmem_limit_bytes=_VMEM_LIMIT),
        cost_estimate=cost0,
    )(x_bf, w1_bf, dout_f)

    # ---- Kernel 1: first aggregation + ReLU + folded (W2 @ Wfc) ----
    xw_res = n_pad * h_pad * 2 <= _RESIDENT_CAP
    xw_spec = (pl.BlockSpec((n_pad, h_pad), lambda i, k: (0, 0)) if xw_res
               else pl.BlockSpec((tk, h_pad), lambda i, k: (k, 0)))
    cost1 = pl.CostEstimate(
        flops=2 * (n_pad * n_pad * h_pad + n_pad * h_pad * o_pad),
        transcendentals=0,
        bytes_accessed=(n_pad * n_pad                                   # int8 A
                        + 2 * (n_pad if xw_res else grid[0] * n_pad) * h_pad
                        + 2 * (h_pad * o_pad + n_pad * o_pad)
                        + 4 * (h_pad + 2 * n_pad)),
    )
    z = pl.pallas_call(
        functools.partial(_conv1_kernel, tk=tk, resident=xw_res),
        out_shape=jax.ShapeDtypeStruct((n_pad, o_pad), jnp.bfloat16),
        grid_spec=pltpu.PrefetchScalarGridSpec(
            num_scalar_prefetch=0,
            grid=grid,
            in_specs=[
                a_spec(),                                            # A (int8)
                xw_spec,                                             # XW (bf16)
                pl.BlockSpec((tm, 1), lambda i, k: (i, 0)),          # D_in^{-1/2}
                pl.BlockSpec((tm, 1), lambda i, k: (i, 0)),          # D_out^{-1/2}
                pl.BlockSpec((1, h_pad), lambda i, k: (0, 0)),       # b1
                pl.BlockSpec((h_pad, o_pad), lambda i, k: (0, 0)),   # W2 @ Wfc
            ],
            out_specs=pl.BlockSpec((tm, o_pad), lambda i, k: (i, 0)),
            scratch_shapes=[pltpu.VMEM((tm, h_pad), jnp.float32)],
        ),
        compiler_params=cparams,
        cost_estimate=cost1,
    )(a_i8, xw, din_f, dout_f, b1_f, w2fc_bf)

    # ---- Kernel 2: second aggregation + folded bias ----
    z_res = n_pad * o_pad * 2 <= _RESIDENT_CAP
    z_spec = (pl.BlockSpec((n_pad, o_pad), lambda i, k: (0, 0)) if z_res
              else pl.BlockSpec((tk, o_pad), lambda i, k: (k, 0)))
    cost2 = pl.CostEstimate(
        flops=2 * n_pad * n_pad * o_pad,
        transcendentals=0,
        bytes_accessed=(n_pad * n_pad
                        + 2 * (n_pad if z_res else grid[0] * n_pad) * o_pad
                        + 4 * (o_pad + n_pad + n_pad * o_pad)),
    )
    out = pl.pallas_call(
        functools.partial(_conv2_kernel, tk=tk, resident=z_res),
        out_shape=jax.ShapeDtypeStruct((n_pad, o_pad), jnp.float32),
        grid_spec=pltpu.PrefetchScalarGridSpec(
            num_scalar_prefetch=0,
            grid=grid,
            in_specs=[
                a_spec(),                                            # A (int8)
                z_spec,                                              # Z (bf16)
                pl.BlockSpec((tm, 1), lambda i, k: (i, 0)),          # D_in^{-1/2}
                pl.BlockSpec((1, o_pad), lambda i, k: (0, 0)),       # b2@Wfc + bfc
            ],
            out_specs=pl.BlockSpec((tm, o_pad), lambda i, k: (i, 0)),
            scratch_shapes=[pltpu.VMEM((tm, o_pad), jnp.float32)],
        ),
        compiler_params=cparams,
        cost_estimate=cost2,
    )(a_i8, z, din_f, b2fc_f)

    return out[:n, :out_dim]


def build_graph_arrays(src, dst, n):
    """Raw adjacency counts (int8) + exact D_in^{-1/2} / D_out^{-1/2} vectors.

    A[i, j] = #edges j -> i (assumed < 128 per pair, true for simple graphs).
    Degrees are clamped to >= 1 (DGL norm='both' with allow_zero_in_degree).
    """
    a = jnp.zeros((n, n), jnp.float32).at[dst, src].add(1.0)
    out_deg = jnp.clip(a.sum(axis=0), 1.0, None)   # out-degree of source j
    in_deg = jnp.clip(a.sum(axis=1), 1.0, None)    # in-degree of target i
    return a.astype(jnp.int8), in_deg ** -0.5, out_deg ** -0.5


def reference_forward_f32(a, din, dout, x, w1, b1, w2, b2, wfc, bfc):
    a_hat = a.astype(jnp.float32) * din[:, None] * dout[None, :]
    h = jnp.maximum(a_hat @ (x @ w1) + b1, 0.0)
    h = a_hat @ (h @ w2) + b2
    return h @ wfc + bfc


def reference_forward_matched(a, din, dout, x, w1, b1, w2, b2, wfc, bfc):
    """Precision-matched reference (same bf16 operand casts, f32 accumulation,
    same exact int adjacency + f32 diagonal normalization placement)."""
    bf, f32 = jnp.bfloat16, jnp.float32
    w2fc = jnp.dot(w2, wfc, preferred_element_type=f32)
    b2fc = jnp.dot(b2, wfc, preferred_element_type=f32) + bfc
    xw = jnp.dot(x.astype(bf), w1.astype(bf), preferred_element_type=f32)
    xw = (xw * dout[:, None]).astype(bf)
    agg1 = jnp.dot(a.astype(bf), xw, preferred_element_type=f32)
    h = jnp.maximum(agg1 * din[:, None] + b1, 0.0)
    z = jnp.dot(h.astype(bf), w2fc.astype(bf), preferred_element_type=f32)
    z = (z * dout[:, None]).astype(bf)
    agg2 = jnp.dot(a.astype(bf), z, preferred_element_type=f32)
    return agg2 * din[:, None] + b2fc


if __name__ == "__main__":
    key = jax.random.PRNGKey(0)
    n_nodes, n_edges = 8, 16
    in_feats = 16
    h_feats = (32, 32, 8)

    ks = jax.random.split(key, 8)
    # Graph (random edge list), node features.
    src = jax.random.randint(ks[0], (n_edges,), 0, n_nodes)
    dst = jax.random.randint(ks[1], (n_edges,), 0, n_nodes)
    a, d_in_isqrt, d_out_isqrt = build_graph_arrays(src, dst, n_nodes)
    x = jax.random.normal(ks[2], (n_nodes, in_feats), jnp.float32)

    # Deterministic parameter init (synthetic; glorot-ish scaling).
    def glorot(k, shape):
        fan_in, fan_out = shape
        s = (6.0 / (fan_in + fan_out)) ** 0.5
        return jax.random.uniform(k, shape, jnp.float32, -s, s)

    w1 = glorot(ks[3], (in_feats, h_feats[0]))
    b1 = jnp.zeros((1, h_feats[0]), jnp.float32)
    w2 = glorot(ks[4], (h_feats[0], h_feats[1]))
    b2 = jnp.zeros((1, h_feats[1]), jnp.float32)
    wfc = glorot(ks[5], (h_feats[1], h_feats[2]))           # nn.Linear weight^T
    bfc = jax.random.uniform(ks[6], (1, h_feats[2]), jnp.float32,
                             -h_feats[1] ** -0.5, h_feats[1] ** -0.5)

    gnn_fn = jax.jit(gnn_forward)
    out = jax.block_until_ready(
        gnn_fn(a, d_in_isqrt, d_out_isqrt, x, w1, b1, w2, b2, wfc, bfc))
    assert out.shape == (n_nodes, h_feats[2])

    # Precision-matched check (same bf16 casts / exact normalization path).
    ref_m = reference_forward_matched(a, d_in_isqrt, d_out_isqrt,
                                      x, w1, b1, w2, b2, wfc, bfc)
    assert jnp.allclose(out, ref_m, atol=5e-3, rtol=5e-3), \
        float(jnp.max(jnp.abs(out - ref_m)))

    # Sanity check vs. pure-f32 math (loose tolerance for bf16 operand rounding).
    ref_f = reference_forward_f32(a, d_in_isqrt, d_out_isqrt,
                                  x, w1, b1, w2, b2, wfc, bfc)
    assert jnp.allclose(out, ref_f, atol=5e-2, rtol=5e-2)

    print("KERNEL_OK")
</pallas_src>

<mosaic_0001>
module attributes {stable_mosaic.version = 11 : i64} {
  func.func @_xw_kernel(%arg0: i32, %arg1: memref<128x128xbf16, #tpu.memory_space<vmem>>, %arg2: memref<128x128xbf16, #tpu.memory_space<vmem>>, %arg3: memref<128x1xf32, #tpu.memory_space<vmem>>, %arg4: memref<128x128xbf16, #tpu.memory_space<vmem>>) attributes {dimension_semantics = [#tpu.dimension_semantics<parallel>], iteration_bounds = array<i64: 1>, scalar_prefetch = 0 : i64, scratch_operands = 0 : i64, tpu.core_type = #tpu.core_type<tc>, window_params = [{transform_indices = @transform_0, window_bounds = array<i64: 128, 128>}, {pipeline_mode = #tpu.pipeline_mode<synchronous>, transform_indices = @transform_1, window_bounds = array<i64: 128, 128>}, {transform_indices = @transform_2, window_bounds = array<i64: 128, 1>}, {transform_indices = @transform_3, window_bounds = array<i64: 128, 128>}]} {
    %c0 = arith.constant 0 : index
    %c0_0 = arith.constant 0 : index
    %0 = vector.load %arg1[%c0, %c0_0] : memref<128x128xbf16, #tpu.memory_space<vmem>>, vector<128x128xbf16>
    %c0_1 = arith.constant 0 : index
    %c0_2 = arith.constant 0 : index
    %1 = vector.load %arg2[%c0_1, %c0_2] : memref<128x128xbf16, #tpu.memory_space<vmem>>, vector<128x128xbf16>
    %cst = arith.constant dense<0.000000e+00> : vector<128x128xf32>
    %2 = tpu.matmul %0, %1, %cst {dimension_numbers = #tpu.dot_dimension_numbers<[1], [0], [0], [1], [0, 0, 1, 1], [], []>} : vector<128x128xbf16>, vector<128x128xbf16>, vector<128x128xf32> -> vector<128x128xf32>
    %c0_3 = arith.constant 0 : index
    %c0_4 = arith.constant 0 : index
    %3 = vector.load %arg3[%c0_3, %c0_4] : memref<128x1xf32, #tpu.memory_space<vmem>>, vector<128x1xf32>
    %4 = vector.broadcast %3 : vector<128x1xf32> to vector<128x128xf32>
    %5 = arith.mulf %2, %4 : vector<128x128xf32>
    %6 = arith.truncf %5 : vector<128x128xf32> to vector<128x128xbf16>
    %c0_5 = arith.constant 0 : index
    %c0_6 = arith.constant 0 : index
    %7 = vector.load %arg4[%c0_5, %c0_6] : memref<128x128xbf16, #tpu.memory_space<vmem>>, vector<128x128xbf16>
    tpu.vector_store %arg4[%c0_5, %c0_6], %6 {strides = array<i32>} : memref<128x128xbf16, #tpu.memory_space<vmem>>, vector<128x128xbf16>,
    return
  }
  func.func @transform_0(%arg0: i32) -> (i32, i32) {
    %c0_i32 = arith.constant 0 : i32
    %c0_i32_0 = arith.constant 0 : i32
    return %arg0, %c0_i32 : i32, i32
  }
  func.func @transform_1(%arg0: i32) -> (i32, i32) {
    %c0_i32 = arith.constant 0 : i32
    %c0_i32_0 = arith.constant 0 : i32
    %c0_i32_1 = arith.constant 0 : i32
    return %c0_i32, %c0_i32_0 : i32, i32
  }
  func.func @transform_2(%arg0: i32) -> (i32, i32) {
    %c0_i32 = arith.constant 0 : i32
    %c0_i32_0 = arith.constant 0 : i32
    return %arg0, %c0_i32 : i32, i32
  }
  func.func @transform_3(%arg0: i32) -> (i32, i32) {
    %c0_i32 = arith.constant 0 : i32
    %c0_i32_0 = arith.constant 0 : i32
    return %arg0, %c0_i32 : i32, i32
  }
}

module attributes {stable_mosaic.version = 11 : i64} {
  func.func @_conv1_kernel(%arg0: i32, %arg1: i32, %arg2: memref<128x128xi8, #tpu.memory_space<vmem>>, %arg3: memref<128x128xbf16, #tpu.memory_space<vmem>>, %arg4: memref<128x1xf32, #tpu.memory_space<vmem>>, %arg5: memref<128x1xf32, #tpu.memory_space<vmem>>, %arg6: memref<1x128xf32, #tpu.memory_space<vmem>>, %arg7: memref<128x128xbf16, #tpu.memory_space<vmem>>, %arg8: memref<128x128xbf16, #tpu.memory_space<vmem>>, %arg9: memref<128x128xf32, #tpu.memory_space<vmem>>) attributes {dimension_semantics = [#tpu.dimension_semantics<parallel>, #tpu.dimension_semantics<arbitrary>], iteration_bounds = array<i64: 1, 1>, scalar_prefetch = 0 : i64, scratch_operands = 1 : i64, tpu.core_type = #tpu.core_type<tc>, window_params = [{transform_indices = @transform_0, window_bounds = array<i64: 128, 128>}, {pipeline_mode = #tpu.pipeline_mode<synchronous>, transform_indices = @transform_1, window_bounds = array<i64: 128, 128>}, {transform_indices = @transform_2, window_bounds = array<i64: 128, 1>}, {transform_indices = @transform_3, window_bounds = array<i64: 128, 1>}, {pipeline_mode = #tpu.pipeline_mode<synchronous>, transform_indices = @transform_4, window_bounds = array<i64: 1, 128>}, {pipeline_mode = #tpu.pipeline_mode<synchronous>, transform_indices = @transform_5, window_bounds = array<i64: 128, 128>}, {transform_indices = @transform_6, window_bounds = array<i64: 128, 128>}]} {
    %c0_i32 = arith.constant 0 : i32
    %0 = arith.cmpi eq, %arg1, %c0_i32 : i32
    %1 = arith.extui %0 : i1 to i32
    %c0_i32_0 = arith.constant 0 : i32
    %2 = arith.cmpi ne, %1, %c0_i32_0 : i32
    scf.if %2 {
      %cst_9 = arith.constant 0.000000e+00 : f32
      %16 = vector.broadcast %cst_9 : f32 to vector<128x128xf32>
      %c0_10 = arith.constant 0 : index
      %c0_11 = arith.constant 0 : index
      %17 = vector.load %arg9[%c0_10, %c0_11] : memref<128x128xf32, #tpu.memory_space<vmem>>, vector<128x128xf32>
      tpu.vector_store %arg9[%c0_10, %c0_11], %16 {strides = array<i32>} : memref<128x128xf32, #tpu.memory_space<vmem>>, vector<128x128xf32>,
    } else {
    }
    %c128_i32 = arith.constant 128 : i32
    %3 = arith.muli %arg1, %c128_i32 : i32
    %4 = tpu.assume_multiple %3, 128 : i32
    %5 = arith.index_cast %4 : i32 to index
    %c0 = arith.constant 0 : index
    %6 = vector.load %arg3[%5, %c0] : memref<128x128xbf16, #tpu.memory_space<vmem>>, vector<128x128xbf16>
    %c0_1 = arith.constant 0 : index
    %c0_2 = arith.constant 0 : index
    %7 = vector.load %arg9[%c0_1, %c0_2] : memref<128x128xf32, #tpu.memory_space<vmem>>, vector<128x128xf32>
    %c0_3 = arith.constant 0 : index
    %c0_4 = arith.constant 0 : index
    %8 = vector.load %arg2[%c0_3, %c0_4] : memref<128x128xi8, #tpu.memory_space<vmem>>, vector<128x128xi8>
    %9 = arith.sitofp %8 : vector<128x128xi8> to vector<128x128xbf16>
    %cst = arith.constant dense<0.000000e+00> : vector<128x128xf32>
    %10 = tpu.matmul %9, %6, %cst {dimension_numbers = #tpu.dot_dimension_numbers<[1], [0], [0], [1], [0, 0, 1, 1], [], []>} : vector<128x128xbf16>, vector<128x128xbf16>, vector<128x128xf32> -> vector<128x128xf32>
    %11 = arith.addf %7, %10 : vector<128x128xf32>
    %c0_5 = arith.constant 0 : index
    %c0_6 = arith.constant 0 : index
    %12 = vector.load %arg9[%c0_5, %c0_6] : memref<128x128xf32, #tpu.memory_space<vmem>>, vector<128x128xf32>
    tpu.vector_store %arg9[%c0_5, %c0_6], %11 {strides = array<i32>} : memref<128x128xf32, #tpu.memory_space<vmem>>, vector<128x128xf32>,
    %c0_i32_7 = arith.constant 0 : i32
    %13 = arith.cmpi eq, %arg1, %c0_i32_7 : i32
    %14 = arith.extui %13 : i1 to i32
    %c0_i32_8 = arith.constant 0 : i32
    %15 = arith.cmpi ne, %14, %c0_i32_8 : i32
    scf.if %15 {
      %c0_9 = arith.constant 0 : index
      %c0_10 = arith.constant 0 : index
      %16 = vector.load %arg9[%c0_9, %c0_10] : memref<128x128xf32, #tpu.memory_space<vmem>>, vector<128x128xf32>
      %c0_11 = arith.constant 0 : index
      %c0_12 = arith.constant 0 : index
      %17 = vector.load %arg4[%c0_11, %c0_12] : memref<128x1xf32, #tpu.memory_space<vmem>>, vector<128x1xf32>
      %18 = vector.broadcast %17 : vector<128x1xf32> to vector<128x128xf32>
      %19 = arith.mulf %16, %18 : vector<128x128xf32>
      %c0_13 = arith.constant 0 : index
      %c0_14 = arith.constant 0 : index
      %20 = vector.load %arg6[%c0_13, %c0_14] : memref<1x128xf32, #tpu.memory_space<vmem>>, vector<1x128xf32>
      %21 = vector.broadcast %20 : vector<1x128xf32> to vector<128x128xf32>
      %22 = arith.addf %19, %21 : vector<128x128xf32>
      %cst_15 = arith.constant 0.000000e+00 : f32
      %23 = vector.broadcast %cst_15 : f32 to vector<128x128xf32>
      %24 = arith.maximumf %22, %23 : vector<128x128xf32>
      %25 = arith.truncf %24 : vector<128x128xf32> to vector<128x128xbf16>
      %c0_16 = arith.constant 0 : index
      %c0_17 = arith.constant 0 : index
      %26 = vector.load %arg7[%c0_16, %c0_17] : memref<128x128xbf16, #tpu.memory_space<vmem>>, vector<128x128xbf16>
      %cst_18 = arith.constant dense<0.000000e+00> : vector<128x128xf32>
      %27 = tpu.matmul %25, %26, %cst_18 {dimension_numbers = #tpu.dot_dimension_numbers<[1], [0], [0], [1], [0, 0, 1, 1], [], []>} : vector<128x128xbf16>, vector<128x128xbf16>, vector<128x128xf32> -> vector<128x128xf32>
      %c0_19 = arith.constant 0 : index
      %c0_20 = arith.constant 0 : index
      %28 = vector.load %arg5[%c0_19, %c0_20] : memref<128x1xf32, #tpu.memory_space<vmem>>, vector<128x1xf32>
      %29 = vector.broadcast %28 : vector<128x1xf32> to vector<128x128xf32>
      %30 = arith.mulf %27, %29 : vector<128x128xf32>
      %31 = arith.truncf %30 : vector<128x128xf32> to vector<128x128xbf16>
      %c0_21 = arith.constant 0 : index
      %c0_22 = arith.constant 0 : index
      %32 = vector.load %arg8[%c0_21, %c0_22] : memref<128x128xbf16, #tpu.memory_space<vmem>>, vector<128x128xbf16>
      tpu.vector_store %arg8[%c0_21, %c0_22], %31 {strides = array<i32>} : memref<128x128xbf16, #tpu.memory_space<vmem>>, vector<128x128xbf16>,
    } else {
    }
    return
  }
  func.func @transform_0(%arg0: i32, %arg1: i32) -> (i32, i32) {
    %c0_i32 = arith.constant 0 : i32
    return %arg0, %arg1 : i32, i32
  }
  func.func @transform_1(%arg0: i32, %arg1: i32) -> (i32, i32) {
    %c0_i32 = arith.constant 0 : i32
    %c0_i32_0 = arith.constant 0 : i32
    %c0_i32_1 = arith.constant 0 : i32
    return %c0_i32, %c0_i32_0 : i32, i32
  }
  func.func @transform_2(%arg0: i32, %arg1: i32) -> (i32, i32) {
    %c0_i32 = arith.constant 0 : i32
    %c0_i32_0 = arith.constant 0 : i32
    return %arg0, %c0_i32 : i32, i32
  }
  func.func @transform_3(%arg0: i32, %arg1: i32) -> (i32, i32) {
    %c0_i32 = arith.constant 0 : i32
    %c0_i32_0 = arith.constant 0 : i32
    return %arg0, %c0_i32 : i32, i32
  }
  func.func @transform_4(%arg0: i32, %arg1: i32) -> (i32, i32) {
    %c0_i32 = arith.constant 0 : i32
    %c0_i32_0 = arith.constant 0 : i32
    %c0_i32_1 = arith.constant 0 : i32
    return %c0_i32, %c0_i32_0 : i32, i32
  }
  func.func @transform_5(%arg0: i32, %arg1: i32) -> (i32, i32) {
    %c0_i32 = arith.constant 0 : i32
    %c0_i32_0 = arith.constant 0 : i32
    %c0_i32_1 = arith.constant 0 : i32
    return %c0_i32, %c0_i32_0 : i32, i32
  }
  func.func @transform_6(%arg0: i32, %arg1: i32) -> (i32, i32) {
    %c0_i32 = arith.constant 0 : i32
    %c0_i32_0 = arith.constant 0 : i32
    return %arg0, %c0_i32 : i32, i32
  }
}

module attributes {stable_mosaic.version = 11 : i64} {
  func.func @_conv2_kernel(%arg0: i32, %arg1: i32, %arg2: memref<128x128xi8, #tpu.memory_space<vmem>>, %arg3: memref<128x128xbf16, #tpu.memory_space<vmem>>, %arg4: memref<128x1xf32, #tpu.memory_space<vmem>>, %arg5: memref<1x128xf32, #tpu.memory_space<vmem>>, %arg6: memref<128x128xf32, #tpu.memory_space<vmem>>, %arg7: memref<128x128xf32, #tpu.memory_space<vmem>>) attributes {dimension_semantics = [#tpu.dimension_semantics<parallel>, #tpu.dimension_semantics<arbitrary>], iteration_bounds = array<i64: 1, 1>, scalar_prefetch = 0 : i64, scratch_operands = 1 : i64, tpu.core_type = #tpu.core_type<tc>, window_params = [{transform_indices = @transform_0, window_bounds = array<i64: 128, 128>}, {pipeline_mode = #tpu.pipeline_mode<synchronous>, transform_indices = @transform_1, window_bounds = array<i64: 128, 128>}, {transform_indices = @transform_2, window_bounds = array<i64: 128, 1>}, {pipeline_mode = #tpu.pipeline_mode<synchronous>, transform_indices = @transform_3, window_bounds = array<i64: 1, 128>}, {transform_indices = @transform_4, window_bounds = array<i64: 128, 128>}]} {
    %c0_i32 = arith.constant 0 : i32
    %0 = arith.cmpi eq, %arg1, %c0_i32 : i32
    %1 = arith.extui %0 : i1 to i32
    %c0_i32_0 = arith.constant 0 : i32
    %2 = arith.cmpi ne, %1, %c0_i32_0 : i32
    scf.if %2 {
      %cst_9 = arith.constant 0.000000e+00 : f32
      %16 = vector.broadcast %cst_9 : f32 to vector<128x128xf32>
      %c0_10 = arith.constant 0 : index
      %c0_11 = arith.constant 0 : index
      %17 = vector.load %arg7[%c0_10, %c0_11] : memref<128x128xf32, #tpu.memory_space<vmem>>, vector<128x128xf32>
      tpu.vector_store %arg7[%c0_10, %c0_11], %16 {strides = array<i32>} : memref<128x128xf32, #tpu.memory_space<vmem>>, vector<128x128xf32>,
    } else {
    }
    %c128_i32 = arith.constant 128 : i32
    %3 = arith.muli %arg1, %c128_i32 : i32
    %4 = tpu.assume_multiple %3, 128 : i32
    %5 = arith.index_cast %4 : i32 to index
    %c0 = arith.constant 0 : index
    %6 = vector.load %arg3[%5, %c0] : memref<128x128xbf16, #tpu.memory_space<vmem>>, vector<128x128xbf16>
    %c0_1 = arith.constant 0 : index
    %c0_2 = arith.constant 0 : index
    %7 = vector.load %arg7[%c0_1, %c0_2] : memref<128x128xf32, #tpu.memory_space<vmem>>, vector<128x128xf32>
    %c0_3 = arith.constant 0 : index
    %c0_4 = arith.constant 0 : index
    %8 = vector.load %arg2[%c0_3, %c0_4] : memref<128x128xi8, #tpu.memory_space<vmem>>, vector<128x128xi8>
    %9 = arith.sitofp %8 : vector<128x128xi8> to vector<128x128xbf16>
    %cst = arith.constant dense<0.000000e+00> : vector<128x128xf32>
    %10 = tpu.matmul %9, %6, %cst {dimension_numbers = #tpu.dot_dimension_numbers<[1], [0], [0], [1], [0, 0, 1, 1], [], []>} : vector<128x128xbf16>, vector<128x128xbf16>, vector<128x128xf32> -> vector<128x128xf32>
    %11 = arith.addf %7, %10 : vector<128x128xf32>
    %c0_5 = arith.constant 0 : index
    %c0_6 = arith.constant 0 : index
    %12 = vector.load %arg7[%c0_5, %c0_6] : memref<128x128xf32, #tpu.memory_space<vmem>>, vector<128x128xf32>
    tpu.vector_store %arg7[%c0_5, %c0_6], %11 {strides = array<i32>} : memref<128x128xf32, #tpu.memory_space<vmem>>, vector<128x128xf32>,
    %c0_i32_7 = arith.constant 0 : i32
    %13 = arith.cmpi eq, %arg1, %c0_i32_7 : i32
    %14 = arith.extui %13 : i1 to i32
    %c0_i32_8 = arith.constant 0 : i32
    %15 = arith.cmpi ne, %14, %c0_i32_8 : i32
    scf.if %15 {
      %c0_9 = arith.constant 0 : index
      %c0_10 = arith.constant 0 : index
      %16 = vector.load %arg7[%c0_9, %c0_10] : memref<128x128xf32, #tpu.memory_space<vmem>>, vector<128x128xf32>
      %c0_11 = arith.constant 0 : index
      %c0_12 = arith.constant 0 : index
      %17 = vector.load %arg4[%c0_11, %c0_12] : memref<128x1xf32, #tpu.memory_space<vmem>>, vector<128x1xf32>
      %18 = vector.broadcast %17 : vector<128x1xf32> to vector<128x128xf32>
      %19 = arith.mulf %16, %18 : vector<128x128xf32>
      %c0_13 = arith.constant 0 : index
      %c0_14 = arith.constant 0 : index
      %20 = vector.load %arg5[%c0_13, %c0_14] : memref<1x128xf32, #tpu.memory_space<vmem>>, vector<1x128xf32>
      %21 = vector.broadcast %20 : vector<1x128xf32> to vector<128x128xf32>
      %22 = arith.addf %19, %21 : vector<128x128xf32>
      %c0_15 = arith.constant 0 : index
      %c0_16 = arith.constant 0 : index
      %23 = vector.load %arg6[%c0_15, %c0_16] : memref<128x128xf32, #tpu.memory_space<vmem>>, vector<128x128xf32>
      tpu.vector_store %arg6[%c0_15, %c0_16], %22 {strides = array<i32>} : memref<128x128xf32, #tpu.memory_space<vmem>>, vector<128x128xf32>,
    } else {
    }
    return
  }
  func.func @transform_0(%arg0: i32, %arg1: i32) -> (i32, i32) {
    %c0_i32 = arith.constant 0 : i32
    return %arg0, %arg1 : i32, i32
  }
  func.func @transform_1(%arg0: i32, %arg1: i32) -> (i32, i32) {
    %c0_i32 = arith.constant 0 : i32
    %c0_i32_0 = arith.constant 0 : i32
    %c0_i32_1 = arith.constant 0 : i32
    return %c0_i32, %c0_i32_0 : i32, i32
  }
  func.func @transform_2(%arg0: i32, %arg1: i32) -> (i32, i32) {
    %c0_i32 = arith.constant 0 : i32
    %c0_i32_0 = arith.constant 0 : i32
    return %arg0, %c0_i32 : i32, i32
  }
  func.func @transform_3(%arg0: i32, %arg1: i32) -> (i32, i32) {
    %c0_i32 = arith.constant 0 : i32
    %c0_i32_0 = arith.constant 0 : i32
    %c0_i32_1 = arith.constant 0 : i32
    return %c0_i32, %c0_i32_0 : i32, i32
  }
  func.func @transform_4(%arg0: i32, %arg1: i32) -> (i32, i32) {
    %c0_i32 = arith.constant 0 : i32
    %c0_i32_0 = arith.constant 0 : i32
    return %arg0, %c0_i32 : i32, i32
  }
}

</mosaic_0001>

<bundles_post_ra>
// kernel: gnn_forward.3
= control target key start
LH: loop header
LB: loop body
LE: loop exit
PB: predicated region body
PF: predicated region fallthrough
CT: control target
= control target key end

     0   :  { %v614_v1 = vmov 0   ;;  %s755_s1 = inlined_call_operand.vmem [shape: bf16[128,128], index: 1, kind: input, shape index: {}]   ;;  %s756_s0 = inlined_call_operand.vmem [shape: bf16[128,128], index: 0, kind: input, shape index: {}]   ;;  %s757_s2 = inlined_call_operand.vmem [shape: f32[128,1], index: 2, kind: input, shape index: {}]   ;;  %s758_s3 = inlined_call_operand.vmem [shape: bf16[128,128], index: 3, kind: output, shape index: {}]  }
   0x1   :  { %v598_v0 = vld [vmem:[%s755_s1 + $0x38] sm:$0xff]   ;;  %597 = vset.pattern.permute.xlu1 %v614_v1  ;;  %596 = vset.pattern.permute.xlu0 %v614_v1  ;;  %v599_v2 = vld [vmem:[%s755_s1 + $0x30] sm:$0xff]   ;;  %v600_v3 = vld [vmem:[%s755_s1 + $0x28] sm:$0xff]  }
   0x2   :  { %547 = vmatprep.subr.bf16.mxu0 %v598_v0  ;;  %579 = vmatprep.subr.bf16.mxu1 %v598_v0  ;;  %v601_v4 = vld [vmem:[%s755_s1 + $0x20] sm:$0xff]   ;;  %v602_v7 = vld [vmem:[%s755_s1 + $0x18] sm:$0xff]   ;;  %v603_v8 = vld [vmem:[%s755_s1 + $0x10] sm:$0xff]  }
   0x3   :  { %548 = vmatpush3.bf16.msra.mxu0 %v598_v0  ;;  %587 = vmatpush3.bf16.msra.mxu1 %v598_v0  ;;  %v606_v5 = vld [vmem:[%s756_s0] sm:$0xff]   ;;  %v242_v9 = vld [vmem:[%s757_s2 + $0x10] sm:$0xff]  ;;  %v243_v11 = vld [vmem:[%s757_s2 + $0x18] sm:$0xff] }
   0x4   :  { %549 = vmatprep.subr.bf16.mxu0 %v599_v2  ;;  %580 = vmatprep.subr.bf16.mxu1 %v599_v2  ;;  %v607_v6 = vld [vmem:[%s756_s0 + $0x20] sm:$0xff]   ;;  %v241_v12 = vld [vmem:[%s757_s2 + $0x8] sm:$0xff]  ;;  %v247_v17 = vld [vmem:[%s757_s2 + $0x38] sm:$0xff] }
   0x5   :  { %563 = vmatprep.mubr.bf16.mxu0 %v606_v5  ;;  %571 = vmatprep.mubr.bf16.mxu1 %v607_v6  ;;  %v240_v10 = vld [vmem:[%s757_s2] sm:$0xff]  ;;  %v604_v13 = vld [vmem:[%s755_s1 + $0x8] sm:$0xff]   ;;  %v246_v18 = vld [vmem:[%s757_s2 + $0x30] sm:$0xff] }
   0x6   :  { %268 = vperm.xlu1 %597, %v242_v9   ;;  %258 = vperm.xlu0 %596, %v240_v10   ;;  %v245_v14 = vld [vmem:[%s757_s2 + $0x28] sm:$0xff]  ;;  %v244_v15 = vld [vmem:[%s757_s2 + $0x20] sm:$0xff]  ;;  %v610_v23 = vld [vmem:[%s756_s0 + $0x10] sm:$0xff]  }
   0x7   :  { %550 = vmatpush3.bf16.msra.mxu0 %v599_v2  ;;  %588 = vmatpush3.bf16.msra.mxu1 %v599_v2  ;;  %v605_v16 = vld [vmem:[%s755_s1] sm:$0xff]   ;;  %v608_v19 = vld [vmem:[%s756_s0 + $0x8] sm:$0xff]   ;;  %v611_v24 = vld [vmem:[%s756_s0 + $0x30] sm:$0xff]  }
   0x8   :  { %551 = vmatprep.subr.bf16.mxu0 %v600_v3  ;;  %581 = vmatprep.subr.bf16.mxu1 %v600_v3  ;;  %v609_v20 = vld [vmem:[%s756_s0 + $0x28] sm:$0xff]   ;;  %v248_v22 = vld [vmem:[%s757_s2 + $0x40] sm:$0xff]  ;;  %v251_v25 = vld [vmem:[%s757_s2 + $0x58] sm:$0xff] }
   0x9   :  { %v249_v21 = vld [vmem:[%s757_s2 + $0x48] sm:$0xff]  ;;  %v250_v26 = vld [vmem:[%s757_s2 + $0x50] sm:$0xff]  ;;  %v612_v27 = vld [vmem:[%s756_s0 + $0x18] sm:$0xff]  }
   0xa   :  { %273 = vperm.xlu1 %597, %v243_v11   ;;  %263 = vperm.xlu0 %596, %v241_v12   ;;  %v613_v28 = vld [vmem:[%s756_s0 + $0x38] sm:$0xff]   ;;  %v253_v29 = vld [vmem:[%s757_s2 + $0x68] sm:$0xff]  ;;  %v252_v30 = vld [vmem:[%s757_s2 + $0x60] sm:$0xff] }
   0xb   :  { %552 = vmatpush3.bf16.msra.mxu0 %v600_v3  ;;  %589 = vmatpush3.bf16.msra.mxu1 %v600_v3  ;;  %v255_v31 = vld [vmem:[%s757_s2 + $0x78] sm:$0xff]  ;;  %v254_v32 = vld [vmem:[%s757_s2 + $0x70] sm:$0xff] }
   0xc   :  { %553 = vmatprep.subr.bf16.mxu0 %v601_v4  ;;  %582 = vmatprep.subr.bf16.mxu1 %v601_v4 }
   0xe   :  { %283 = vperm.xlu1 %597, %v245_v14   ;;  %278 = vperm.xlu0 %596, %v244_v15  }
   0xf   :  { %554 = vmatpush3.bf16.msra.mxu0 %v601_v4  ;;  %590 = vmatpush3.bf16.msra.mxu1 %v601_v4 }
  0x10   :  { %555 = vmatprep.subr.bf16.mxu0 %v602_v7  ;;  %583 = vmatprep.subr.bf16.mxu1 %v602_v7 }
  0x12   :  { %293 = vperm.xlu1 %597, %v247_v17   ;;  %288 = vperm.xlu0 %596, %v246_v18  }
  0x13   :  { %556 = vmatpush3.bf16.msra.mxu0 %v602_v7  ;;  %591 = vmatpush3.bf16.msra.mxu1 %v602_v7 }
  0x14   :  { %557 = vmatprep.subr.bf16.mxu0 %v603_v8  ;;  %584 = vmatprep.subr.bf16.mxu1 %v603_v8 }
  0x16   :  { %303 = vperm.xlu1 %597, %v249_v21   ;;  %298 = vperm.xlu0 %596, %v248_v22  }
  0x17   :  { %558 = vmatpush3.bf16.msra.mxu0 %v603_v8  ;;  %592 = vmatpush3.bf16.msra.mxu1 %v603_v8 }
  0x18   :  { %559 = vmatprep.subr.bf16.mxu0 %v604_v13  ;;  %585 = vmatprep.subr.bf16.mxu1 %v604_v13 }
  0x1a   :  { %313 = vperm.xlu1 %597, %v251_v25   ;;  %308 = vperm.xlu0 %596, %v250_v26  }
  0x1b   :  { %560 = vmatpush3.bf16.msra.mxu0 %v604_v13  ;;  %593 = vmatpush3.bf16.msra.mxu1 %v604_v13 }
  0x1c   :  { %561 = vmatprep.subr.bf16.mxu0 %v605_v16  ;;  %586 = vmatprep.subr.bf16.mxu1 %v605_v16 }
  0x1e   :  { %323 = vperm.xlu1 %597, %v253_v29   ;;  %318 = vperm.xlu0 %596, %v252_v30  }
  0x1f   :  { %562 = vmatpush3.bf16.msra.mxu0 %v605_v16  ;;  %594 = vmatpush3.bf16.msra.mxu1 %v605_v16 }
  0x22   :  { %564 = vmatmul.mubr.bf16.vlgmr.msra.gmra.mxu0 %v608_v19  ;;  %572 = vmatmul.mubr.bf16.vlgmr.msra.gmra.mxu1 %v609_v20 }
  0x23   :  { %567 = vmatprep.mubr.bf16.mxu0 %v610_v23  ;;  %575 = vmatprep.mubr.bf16.mxu1 %v611_v24 }
  0x24   :  { %333 = vperm.xlu1 %597, %v255_v31   ;;  %328 = vperm.xlu0 %596, %v254_v32  }
  0x2a   :  { %568 = vmatmul.mubr.bf16.gmra.mxu0 %v612_v27  ;;  %576 = vmatmul.mubr.bf16.gmra.mxu1 %v613_v28 }
  0x81   :  { %v269_v33 = vpop.permute.xlu1 %268  ;;  %v259_v34 = vpop.permute.xlu0 %258 }
  0x85   :  { %v274_v35 = vpop.permute.xlu1 %273  ;;  %v264_v36 = vpop.permute.xlu0 %263 }
  0x89   :  { %v284_v37 = vpop.permute.xlu1 %283  ;;  %v279_v38 = vpop.permute.xlu0 %278 }
  0x8d   :  { %v294_v39 = vpop.permute.xlu1 %293  ;;  %v289_v40 = vpop.permute.xlu0 %288 }
  0x91   :  { %v304_v41 = vpop.permute.xlu1 %303  ;;  %v299_v42 = vpop.permute.xlu0 %298 }
  0x95   :  { %v314_v43 = vpop.permute.xlu1 %313  ;;  %v309_v44 = vpop.permute.xlu0 %308 }
  0x99   :  { %v324_v51 = vpop.permute.xlu1 %323  ;;  %v319_v52 = vpop.permute.xlu0 %318 }
  0x9f   :  { %v334_v7 = vpop.permute.xlu1 %333  ;;  %v329_v8 = vpop.permute.xlu0 %328 }
  0xe2   :  { %v565_v45 = vpop.f32.mrf.mxu0  ;;  %v573_v46 = vpop.f32.mrf.mxu1 }
  0xe3   :  { %v338_v53 = vmul.f32 %v565_v45, %v269_v33  ;;  %v346_v54 = vmul.f32 %v573_v46, %v309_v44 }
  0xe4   :  { %v177_v47 = vpop.f32.mrf.mxu0  ;;  %v209_v48 = vpop.f32.mrf.mxu1 }
  0xe5   :  { %v336_v57 = vmul.f32 %v259_v34, %v177_v47  ;;  %v344_v58 = vmul.f32 %v299_v42, %v209_v48 }
  0xe6   :  { %v566_v49 = vpop.f32.mrf.mxu0  ;;  %v574_v50 = vpop.f32.mrf.mxu1 }
  0xe7   :  { %v339_v55 = vmul.f32 %v566_v49, %v274_v35  ;;  %v347_v56 = vmul.f32 %v574_v50, %v314_v43 }
  0xe8   :  { %v180_v59 = vpop.f32.mrf.mxu0  ;;  %v212_v60 = vpop.f32.mrf.mxu1 }
  0xe9   :  { %v492_v61 = vpack.c.bf16 %v339_v55, %v338_v53  ;;  %v512_v62 = vpack.c.bf16 %v347_v56, %v346_v54  ;;  %v337_v63 = vmul.f32 %v264_v36, %v180_v59  ;;  %v345_v0 = vmul.f32 %v304_v41, %v212_v60 }
  0xea   :  { %v569_v1 = vpop.f32.mrf.mxu0  ;;  %v577_v2 = vpop.f32.mrf.mxu1 }
  0xeb   :  { %524 = vst [vmem:[%s758_s3 + $0x8] sm:$0xff] %v492_v61   ;;  %528 = vst [vmem:[%s758_s3 + $0x28] sm:$0xff] %v512_v62   ;;  %v487_v3 = vpack.c.bf16 %v337_v63, %v336_v57  ;;  %v507_v4 = vpack.c.bf16 %v345_v0, %v344_v58  ;;  %v342_v11 = vmul.f32 %v569_v1, %v289_v40 }
  0xec   :  { %v193_v5 = vpop.f32.mrf.mxu0  ;;  %v225_v6 = vpop.f32.mrf.mxu1  ;;  %v350_v12 = vmul.f32 %v577_v2, %v329_v8 }
  0xed   :  { %488 = vst [vmem:[%s758_s3] sm:$0xff] %v487_v3   ;;  %527 = vst [vmem:[%s758_s3 + $0x20] sm:$0xff] %v507_v4   ;;  %v340_v15 = vmul.f32 %v279_v38, %v193_v5  ;;  %v348_v16 = vmul.f32 %v319_v52, %v225_v6 }
  0xee   :  { %v570_v9 = vpop.f32.mrf.mxu0  ;;  %v578_v10 = vpop.f32.mrf.mxu1 }
  0xef   :  { %v343_v13 = vmul.f32 %v570_v9, %v294_v39  ;;  %v351_v14 = vmul.f32 %v578_v10, %v334_v7 }
  0xf0   :  { %v196_v17 = vpop.f32.mrf.mxu0  ;;  %v228_v18 = vpop.f32.mrf.mxu1 }
  0xf1   :  { %v502_v19 = vpack.c.bf16 %v343_v13, %v342_v11  ;;  %v522_v20 = vpack.c.bf16 %v351_v14, %v350_v12  ;;  %v341_v21 = vmul.f32 %v284_v37, %v196_v17  ;;  %v349_v22 = vmul.f32 %v324_v51, %v228_v18 }
  0xf3   :  { %526 = vst [vmem:[%s758_s3 + $0x18] sm:$0xff] %v502_v19   ;;  %530 = vst [vmem:[%s758_s3 + $0x38] sm:$0xff] %v522_v20   ;;  %v497_v23 = vpack.c.bf16 %v341_v21, %v340_v15  ;;  %v517_v24 = vpack.c.bf16 %v349_v22, %v348_v16 }
  0xf5   :  { %525 = vst [vmem:[%s758_s3 + $0x10] sm:$0xff] %v497_v23   ;;  %529 = vst [vmem:[%s758_s3 + $0x30] sm:$0xff] %v517_v24  }

// kernel: gnn_forward.5
= control target key start
LH: loop header
LB: loop body
LE: loop exit
PB: predicated region body
PF: predicated region fallthrough
CT: control target
= control target key end

     0   :  { %v524_v1 = vmov 0   ;;  %s714_s1 = inlined_call_operand.vmem [shape: bf16[128,128], index: 1, kind: input, shape index: {}]   ;;  %s715_s0 = inlined_call_operand.vmem [shape: s8[128,128], index: 0, kind: input, shape index: {}]   ;;  %s716_s2 = inlined_call_operand.vmem [shape: f32[128,1], index: 2, kind: input, shape index: {}]   ;;  %s717_s3 = inlined_call_operand.vmem [shape: f32[1,128], index: 3, kind: input, shape index: {}]   ;;  %s718_s4 = inlined_call_operand.vmem [shape: f32[128,128], index: 4, kind: output, shape index: {}]  }
   0x1   :  { %v516_v0 = vld [vmem:[%s714_s1 + $0x38] sm:$0xff]   ;;  %515 = vset.pattern.permute.xlu1 %v524_v1  ;;  %514 = vset.pattern.permute.xlu0 %v524_v1  ;;  %v517_v2 = vld [vmem:[%s714_s1 + $0x30] sm:$0xff]   ;;  %v518_v3 = vld [vmem:[%s714_s1 + $0x28] sm:$0xff]  }
   0x2   :  { %465 = vmatprep.subr.bf16.mxu0 %v516_v0  ;;  %497 = vmatprep.subr.bf16.mxu1 %v516_v0  ;;  %v519_v4 = vld [vmem:[%s714_s1 + $0x20] sm:$0xff]   ;;  %v570_v6 = vld [vmem:[%s715_s0 + $0x10] sm:$0xff]  ;;  %v286_v11 = vld [vmem:[%s716_s2 + $0x18] sm:$0xff] }
   0x3   :  { %466 = vmatpush3.bf16.msra.mxu0 %v516_v0  ;;  %505 = vmatpush3.bf16.msra.mxu1 %v516_v0  ;;  %v565_v5 = vld [vmem:[%s715_s0] sm:$0xff]  ;;  %v83_v8 = vunpack.c.l.s8.bf16 %v570_v6  ;;  %v285_v9 = vld [vmem:[%s716_s2 + $0x10] sm:$0xff]  ;;  %v284_v12 = vld [vmem:[%s716_s2 + $0x8] sm:$0xff]  ;;  %v84_v28 = vunpack.c.h.s8.bf16 %v570_v6 }
   0x4   :  { %467 = vmatprep.subr.bf16.mxu0 %v517_v2  ;;  %498 = vmatprep.subr.bf16.mxu1 %v517_v2  ;;  %v79_v7 = vunpack.c.l.s8.bf16 %v565_v5  ;;  %v283_v10 = vld [vmem:[%s716_s2] sm:$0xff]  ;;  %v520_v13 = vld [vmem:[%s714_s1 + $0x18] sm:$0xff]   ;;  %v288_v14 = vld [vmem:[%s716_s2 + $0x28] sm:$0xff]  ;;  %v80_v27 = vunpack.c.h.s8.bf16 %v565_v5 }
   0x5   :  { %311 = vperm.xlu1 %515, %v285_v9   ;;  %301 = vperm.xlu0 %514, %v283_v10   ;;  %v287_v15 = vld [vmem:[%s716_s2 + $0x20] sm:$0xff]  ;;  %v521_v16 = vld [vmem:[%s714_s1 + $0x10] sm:$0xff]   ;;  %v290_v17 = vld [vmem:[%s716_s2 + $0x38] sm:$0xff] }
   0x6   :  { %481 = vmatprep.mubr.bf16.mxu0 %v79_v7  ;;  %489 = vmatprep.mubr.bf16.mxu1 %v83_v8  ;;  %v289_v18 = vld [vmem:[%s716_s2 + $0x30] sm:$0xff]  ;;  %v522_v19 = vld [vmem:[%s714_s1 + $0x8] sm:$0xff]   ;;  %v291_v21 = vld [vmem:[%s716_s2 + $0x40] sm:$0xff] }
   0x7   :  { %468 = vmatpush3.bf16.msra.mxu0 %v517_v2  ;;  %506 = vmatpush3.bf16.msra.mxu1 %v517_v2  ;;  %v292_v20 = vld [vmem:[%s716_s2 + $0x48] sm:$0xff]  ;;  %v523_v22 = vld [vmem:[%s714_s1] sm:$0xff]   ;;  %v294_v23 = vld [vmem:[%s716_s2 + $0x58] sm:$0xff] }
   0x8   :  { %469 = vmatprep.subr.bf16.mxu0 %v518_v3  ;;  %499 = vmatprep.subr.bf16.mxu1 %v518_v3  ;;  %v293_v24 = vld [vmem:[%s716_s2 + $0x50] sm:$0xff]  ;;  %v76_v25 = vld [vmem:[%s715_s0 + $0x8] sm:$0xff]  ;;  %v78_v26 = vld [vmem:[%s715_s0 + $0x18] sm:$0xff] }
   0x9   :  { %316 = vperm.xlu1 %515, %v286_v11   ;;  %306 = vperm.xlu0 %514, %v284_v12   ;;  %v81_v29 = vunpack.c.l.s8.bf16 %v76_v25  ;;  %v85_v30 = vunpack.c.l.s8.bf16 %v78_v26  ;;  %v296_v31 = vld [vmem:[%s716_s2 + $0x68] sm:$0xff]  ;;  %v295_v32 = vld [vmem:[%s716_s2 + $0x60] sm:$0xff]  ;;  %v298_v33 = vld [vmem:[%s716_s2 + $0x78] sm:$0xff]  ;;  %v82_v35 = vunpack.c.h.s8.bf16 %v76_v25  ;;  %v86_v36 = vunpack.c.h.s8.bf16 %v78_v26 }
   0xa   :  { %v297_v34 = vld [vmem:[%s716_s2 + $0x70] sm:$0xff]  ;;  %v647_v50 = vld [vmem:[%s717_s3] ss:$0 sm:$0xff] }
   0xb   :  { %470 = vmatpush3.bf16.msra.mxu0 %v518_v3  ;;  %507 = vmatpush3.bf16.msra.mxu1 %v518_v3 }
   0xc   :  { %471 = vmatprep.subr.bf16.mxu0 %v519_v4  ;;  %500 = vmatprep.subr.bf16.mxu1 %v519_v4 }
   0xd   :  { %326 = vperm.xlu1 %515, %v288_v14   ;;  %321 = vperm.xlu0 %514, %v287_v15  }
   0xf   :  { %472 = vmatpush3.bf16.msra.mxu0 %v519_v4  ;;  %508 = vmatpush3.bf16.msra.mxu1 %v519_v4 }
  0x10   :  { %473 = vmatprep.subr.bf16.mxu0 %v520_v13  ;;  %501 = vmatprep.subr.bf16.mxu1 %v520_v13 }
  0x11   :  { %336 = vperm.xlu1 %515, %v290_v17   ;;  %331 = vperm.xlu0 %514, %v289_v18  }
  0x13   :  { %474 = vmatpush3.bf16.msra.mxu0 %v520_v13  ;;  %509 = vmatpush3.bf16.msra.mxu1 %v520_v13 }
  0x14   :  { %475 = vmatprep.subr.bf16.mxu0 %v521_v16  ;;  %502 = vmatprep.subr.bf16.mxu1 %v521_v16 }
  0x15   :  { %346 = vperm.xlu1 %515, %v292_v20   ;;  %341 = vperm.xlu0 %514, %v291_v21  }
  0x17   :  { %476 = vmatpush3.bf16.msra.mxu0 %v521_v16  ;;  %510 = vmatpush3.bf16.msra.mxu1 %v521_v16 }
  0x18   :  { %477 = vmatprep.subr.bf16.mxu0 %v522_v19  ;;  %503 = vmatprep.subr.bf16.mxu1 %v522_v19 }
  0x19   :  { %356 = vperm.xlu1 %515, %v294_v23   ;;  %351 = vperm.xlu0 %514, %v293_v24  }
  0x1b   :  { %478 = vmatpush3.bf16.msra.mxu0 %v522_v19  ;;  %511 = vmatpush3.bf16.msra.mxu1 %v522_v19 }
  0x1c   :  { %479 = vmatprep.subr.bf16.mxu0 %v523_v22  ;;  %504 = vmatprep.subr.bf16.mxu1 %v523_v22 }
  0x1d   :  { %366 = vperm.xlu1 %515, %v296_v31   ;;  %361 = vperm.xlu0 %514, %v295_v32  }
  0x1f   :  { %480 = vmatpush3.bf16.msra.mxu0 %v523_v22  ;;  %512 = vmatpush3.bf16.msra.mxu1 %v523_v22 }
  0x21   :  { %376 = vperm.xlu1 %515, %v298_v33   ;;  %371 = vperm.xlu0 %514, %v297_v34  }
  0x22   :  { %482 = vmatmul.mubr.bf16.vlgmr.msra.gmra.mxu0 %v80_v27  ;;  %490 = vmatmul.mubr.bf16.vlgmr.msra.gmra.mxu1 %v84_v28 }
  0x23   :  { %485 = vmatprep.mubr.bf16.mxu0 %v81_v29  ;;  %493 = vmatprep.mubr.bf16.mxu1 %v85_v30 }
  0x2a   :  { %486 = vmatmul.mubr.bf16.gmra.mxu0 %v82_v35  ;;  %494 = vmatmul.mubr.bf16.gmra.mxu1 %v86_v36 }
  0x80   :  { %v302_v37 = vpop.permute.xlu0 %301  ;;  %v312_v38 = vpop.permute.xlu1 %311 }
  0x84   :  { %v307_v39 = vpop.permute.xlu0 %306  ;;  %v317_v40 = vpop.permute.xlu1 %316 }
  0x88   :  { %v322_v41 = vpop.permute.xlu0 %321  ;;  %v642_v42 = vpop.permute.xlu1 %326 }
  0x8c   :  { %v332_v43 = vpop.permute.xlu0 %331  ;;  %v337_v44 = vpop.permute.xlu1 %336 }
  0x90   :  { %v342_v45 = vpop.permute.xlu0 %341  ;;  %v347_v46 = vpop.permute.xlu1 %346 }
  0x94   :  { %v352_v47 = vpop.permute.xlu0 %351  ;;  %v357_v48 = vpop.permute.xlu1 %356 }
  0x98   :  { %v362_v52 = vpop.permute.xlu0 %361  ;;  %v367_v63 = vpop.permute.xlu1 %366 }
  0x9c   :  { %v372_v6 = vpop.permute.xlu0 %371  ;;  %v377_v19 = vpop.permute.xlu1 %376 }
  0xe2   :  { %v483_v49 = vpop.f32.mrf.mxu0  ;;  %v491_v51 = vpop.f32.mrf.mxu1 }
  0xe3   :  { %v381_v53 = vmul.f32 %v483_v49, %v312_v38  ;;  %v389_v54 = vmul.f32 %v491_v51, %v352_v47 }
  0xe4   :  { %v169_v55 = vpop.f32.mrf.mxu0  ;;  %v201_v56 = vpop.f32.mrf.mxu1 }
  0xe5   :  { %v404_v57 = vadd.f32 %v647_v50, %v381_v53  ;;  %v412_v58 = vadd.f32 %v647_v50, %v389_v54  ;;  %v379_v59 = vmul.f32 %v302_v37, %v169_v55  ;;  %v387_v60 = vmul.f32 %v342_v45, %v201_v56 }
  0xe6   :  { %v484_v61 = vpop.f32.mrf.mxu0  ;;  %v492_v62 = vpop.f32.mrf.mxu1 }
  0xe7   :  { %420 = vst [vmem:[%s718_s4 + $0x10] sm:$0xff] %v404_v57  ;;  %428 = vst [vmem:[%s718_s4 + $0x50] sm:$0xff] %v412_v58  ;;  %v402_v0 = vadd.f32 %v647_v50, %v379_v59  ;;  %v410_v1 = vadd.f32 %v647_v50, %v387_v60  ;;  %v382_v2 = vmul.f32 %v484_v61, %v317_v40 }
  0xe8   :  { %v390_v3 = vmul.f32 %v492_v62, %v357_v48  ;;  %v172_v4 = vpop.f32.mrf.mxu0  ;;  %v204_v5 = vpop.f32.mrf.mxu1 }
  0xe9   :  { %418 = vst [vmem:[%s718_s4] sm:$0xff] %v402_v0  ;;  %426 = vst [vmem:[%s718_s4 + $0x40] sm:$0xff] %v410_v1  ;;  %v405_v7 = vadd.f32 %v647_v50, %v382_v2  ;;  %v380_v9 = vmul.f32 %v307_v39, %v172_v4  ;;  %v388_v10 = vmul.f32 %v347_v46, %v204_v5 }
  0xea   :  { %v413_v8 = vadd.f32 %v647_v50, %v390_v3  ;;  %v487_v11 = vpop.f32.mrf.mxu0  ;;  %v495_v12 = vpop.f32.mrf.mxu1 }
  0xeb   :  { %421 = vst [vmem:[%s718_s4 + $0x18] sm:$0xff] %v405_v7  ;;  %v403_v13 = vadd.f32 %v647_v50, %v380_v9  ;;  %v411_v14 = vadd.f32 %v647_v50, %v388_v10  ;;  %v385_v15 = vmul.f32 %v487_v11, %v332_v43  ;;  %v393_v16 = vmul.f32 %v495_v12, %v372_v6 }
  0xec   :  { %429 = vst [vmem:[%s718_s4 + $0x58] sm:$0xff] %v413_v8  ;;  %v185_v17 = vpop.f32.mrf.mxu0  ;;  %v217_v18 = vpop.f32.mrf.mxu1 }
  0xed   :  { %419 = vst [vmem:[%s718_s4 + $0x8] sm:$0xff] %v403_v13  ;;  %427 = vst [vmem:[%s718_s4 + $0x48] sm:$0xff] %v411_v14  ;;  %v408_v20 = vadd.f32 %v647_v50, %v385_v15  ;;  %v416_v21 = vadd.f32 %v647_v50, %v393_v16  ;;  %v383_v22 = vmul.f32 %v322_v41, %v185_v17 }
  0xee   :  { %v391_v23 = vmul.f32 %v362_v52, %v217_v18  ;;  %v488_v24 = vpop.f32.mrf.mxu0  ;;  %v496_v25 = vpop.f32.mrf.mxu1 }
  0xef   :  { %424 = vst [vmem:[%s718_s4 + $0x30] sm:$0xff] %v408_v20  ;;  %432 = vst [vmem:[%s718_s4 + $0x70] sm:$0xff] %v416_v21  ;;  %v406_v26 = vadd.f32 %v647_v50, %v383_v22  ;;  %v386_v28 = vmul.f32 %v488_v24, %v337_v44  ;;  %v394_v29 = vmul.f32 %v496_v25, %v377_v19 }
  0xf0   :  { %v414_v27 = vadd.f32 %v647_v50, %v391_v23  ;;  %v188_v30 = vpop.f32.mrf.mxu0  ;;  %v220_v31 = vpop.f32.mrf.mxu1 }
  0xf1   :  { %422 = vst [vmem:[%s718_s4 + $0x20] sm:$0xff] %v406_v26  ;;  %v409_v32 = vadd.f32 %v647_v50, %v386_v28  ;;  %v417_v33 = vadd.f32 %v647_v50, %v394_v29  ;;  %v384_v34 = vmul.f32 %v642_v42, %v188_v30  ;;  %v392_v35 = vmul.f32 %v367_v63, %v220_v31 }
  0xf2   :  { %430 = vst [vmem:[%s718_s4 + $0x60] sm:$0xff] %v414_v27 }
  0xf3   :  { %425 = vst [vmem:[%s718_s4 + $0x38] sm:$0xff] %v409_v32  ;;  %433 = vst [vmem:[%s718_s4 + $0x78] sm:$0xff] %v417_v33  ;;  %v407_v36 = vadd.f32 %v647_v50, %v384_v34  ;;  %v415_v37 = vadd.f32 %v647_v50, %v392_v35 }
  0xf5   :  { %423 = vst [vmem:[%s718_s4 + $0x28] sm:$0xff] %v407_v36  ;;  %431 = vst [vmem:[%s718_s4 + $0x68] sm:$0xff] %v415_v37 }

// kernel: gnn_forward.4
= control target key start
LH: loop header
LB: loop body
LE: loop exit
PB: predicated region body
PF: predicated region fallthrough
CT: control target
= control target key end

     0   :  { %v1018_v1 = vmov 0   ;;  %s1255_s1 = inlined_call_operand.vmem [shape: bf16[128,128], index: 1, kind: input, shape index: {}]   ;;  %s1256_s0 = inlined_call_operand.vmem [shape: s8[128,128], index: 0, kind: input, shape index: {}]   ;;  %s1257_s2 = inlined_call_operand.vmem [shape: f32[128,1], index: 2, kind: input, shape index: {}]   ;;  %s1258_s3 = inlined_call_operand.vmem [shape: f32[128,1], index: 3, kind: input, shape index: {}]   ;;  %s1259_s5 = inlined_call_operand.vmem [shape: bf16[128,128], index: 5, kind: input, shape index: {}]   ;;  %s1260_s4 = inlined_call_operand.vmem [shape: f32[1,128], index: 4, kind: input, shape index: {}]   ;;  %s1261_s6 = inlined_call_operand.vmem [shape: bf16[128,128], index: 6, kind: output, shape index: {}]  }
   0x1   :  { %v1002_v0 = vld [vmem:[%s1255_s1 + $0x38] sm:$0xff]   ;;  %1000 = vset.pattern.permute.xlu0 %v1018_v1  ;;  %1001 = vset.pattern.permute.xlu1 %v1018_v1  ;;  %v1003_v2 = vld [vmem:[%s1255_s1 + $0x30] sm:$0xff]   ;;  %v1004_v3 = vld [vmem:[%s1255_s1 + $0x28] sm:$0xff]  }
   0x2   :  { %935 = vmatprep.subr.bf16.mxu0 %v1002_v0  ;;  %v1005_v4 = vld [vmem:[%s1255_s1 + $0x20] sm:$0xff]   ;;  %v291_v8 = vld [vmem:[%s1257_s2 + $0x10] sm:$0xff]  ;;  %v290_v9 = vld [vmem:[%s1257_s2 + $0x8] sm:$0xff] }
   0x3   :  { %936 = vmatpush3.bf16.msra.mxu0 %v1002_v0  ;;  %v81_v5 = vld [vmem:[%s1256_s0] sm:$0xff]  ;;  %317 = vperm.xlu1 %1001, %v291_v8   ;;  %v292_v10 = vld [vmem:[%s1257_s2 + $0x18] sm:$0xff]  ;;  %v294_v13 = vld [vmem:[%s1257_s2 + $0x28] sm:$0xff] }
   0x4   :  { %937 = vmatprep.subr.bf16.mxu0 %v1003_v2  ;;  %v289_v6 = vld [vmem:[%s1257_s2] sm:$0xff]  ;;  %v85_v7 = vunpack.c.l.s8.bf16 %v81_v5  ;;  %v1006_v11 = vld [vmem:[%s1255_s1 + $0x18] sm:$0xff]   ;;  %v1007_v14 = vld [vmem:[%s1255_s1 + $0x10] sm:$0xff]   ;;  %v86_v24 = vunpack.c.h.s8.bf16 %v81_v5 }
   0x5   :  { %307 = vperm.xlu0 %1000, %v289_v6   ;;  %v293_v12 = vld [vmem:[%s1257_s2 + $0x20] sm:$0xff]  ;;  %v295_v15 = vld [vmem:[%s1257_s2 + $0x30] sm:$0xff]  ;;  %v296_v16 = vld [vmem:[%s1257_s2 + $0x38] sm:$0xff] }
   0x6   :  { %951 = vmatprep.mubr.bf16.mxu0 %v85_v7  ;;  %v1008_v17 = vld [vmem:[%s1255_s1 + $0x8] sm:$0xff]   ;;  %v297_v18 = vld [vmem:[%s1257_s2 + $0x40] sm:$0xff]  ;;  %v299_v21 = vld [vmem:[%s1257_s2 + $0x50] sm:$0xff] }
   0x7   :  { %938 = vmatpush3.bf16.msra.mxu0 %v1003_v2  ;;  %322 = vperm.xlu1 %1001, %v292_v10   ;;  %v298_v19 = vld [vmem:[%s1257_s2 + $0x48] sm:$0xff]  ;;  %v1009_v20 = vld [vmem:[%s1255_s1] sm:$0xff]   ;;  %v300_v22 = vld [vmem:[%s1257_s2 + $0x58] sm:$0xff] }
   0x8   :  { %939 = vmatprep.subr.bf16.mxu0 %v1004_v3  ;;  %v82_v23 = vld [vmem:[%s1256_s0 + $0x8] sm:$0xff]  ;;  %v301_v25 = vld [vmem:[%s1257_s2 + $0x60] sm:$0xff]  ;;  %v303_v28 = vld [vmem:[%s1257_s2 + $0x70] sm:$0xff] }
   0x9   :  { %312 = vperm.xlu0 %1000, %v290_v9   ;;  %v87_v26 = vunpack.c.l.s8.bf16 %v82_v23  ;;  %v302_v27 = vld [vmem:[%s1257_s2 + $0x68] sm:$0xff]  ;;  %v304_v29 = vld [vmem:[%s1257_s2 + $0x78] sm:$0xff]  ;;  %v83_v30 = vld [vmem:[%s1256_s0 + $0x10] sm:$0xff]  ;;  %v88_v31 = vunpack.c.h.s8.bf16 %v82_v23 }
   0xa   :  { %v609_v32 = vld [vmem:[%s1258_s3] sm:$0xff]  ;;  %v89_v33 = vunpack.c.l.s8.bf16 %v83_v30  ;;  %v610_v34 = vld [vmem:[%s1258_s3 + $0x8] sm:$0xff]  ;;  %v611_v35 = vld [vmem:[%s1258_s3 + $0x10] sm:$0xff]  ;;  %v90_v40 = vunpack.c.h.s8.bf16 %v83_v30 }
   0xb   :  { %940 = vmatpush3.bf16.msra.mxu0 %v1004_v3  ;;  %332 = vperm.xlu1 %1001, %v294_v13   ;;  %v612_v36 = vld [vmem:[%s1258_s3 + $0x18] sm:$0xff]  ;;  %v613_v38 = vld [vmem:[%s1258_s3 + $0x20] sm:$0xff]  ;;  %v614_v39 = vld [vmem:[%s1258_s3 + $0x28] sm:$0xff] }
   0xc   :  { %941 = vmatprep.subr.bf16.mxu0 %v1005_v4  ;;  %v84_v37 = vld [vmem:[%s1256_s0 + $0x18] sm:$0xff]  ;;  %v615_v43 = vld [vmem:[%s1258_s3 + $0x30] sm:$0xff]  ;;  %v1012_v46 = vld [vmem:[%s1259_s5 + $0x28] sm:$0xff]  }
   0xd   :  { %327 = vperm.xlu0 %1000, %v293_v12   ;;  %v1010_v41 = vld [vmem:[%s1259_s5 + $0x38] sm:$0xff]   ;;  %v91_v42 = vunpack.c.l.s8.bf16 %v84_v37  ;;  %v1011_v45 = vld [vmem:[%s1259_s5 + $0x30] sm:$0xff]   ;;  %v92_v47 = vunpack.c.h.s8.bf16 %v84_v37  ;;  %v617_v48 = vld [vmem:[%s1258_s3 + $0x40] sm:$0xff] }
   0xe   :  { %967 = vmatprep.subr.bf16.mxu1 %v1010_v41  ;;  %v616_v44 = vld [vmem:[%s1258_s3 + $0x38] sm:$0xff]  ;;  %v618_v49 = vld [vmem:[%s1258_s3 + $0x48] sm:$0xff]  ;;  %v1013_v50 = vld [vmem:[%s1259_s5 + $0x20] sm:$0xff]  }
   0xf   :  { %942 = vmatpush3.bf16.msra.mxu0 %v1005_v4  ;;  %342 = vperm.xlu1 %1001, %v296_v16   ;;  %v619_v51 = vld [vmem:[%s1258_s3 + $0x50] sm:$0xff]  ;;  %v620_v52 = vld [vmem:[%s1258_s3 + $0x58] sm:$0xff]  ;;  %v621_v53 = vld [vmem:[%s1258_s3 + $0x60] sm:$0xff] }
  0x10   :  { %943 = vmatprep.subr.bf16.mxu0 %v1006_v11  ;;  %968 = vmatpush3.bf16.msra.mxu1 %v1010_v41  ;;  %v622_v54 = vld [vmem:[%s1258_s3 + $0x68] sm:$0xff]  ;;  %v623_v55 = vld [vmem:[%s1258_s3 + $0x70] sm:$0xff]  ;;  %v624_v56 = vld [vmem:[%s1258_s3 + $0x78] sm:$0xff] }
  0x11   :  { %337 = vperm.xlu0 %1000, %v295_v15   ;;  %969 = vmatprep.subr.bf16.mxu1 %v1011_v45  ;;  %v1014_v57 = vld [vmem:[%s1259_s5 + $0x18] sm:$0xff]   ;;  %v1015_v58 = vld [vmem:[%s1259_s5 + $0x10] sm:$0xff]   ;;  %v1016_v59 = vld [vmem:[%s1259_s5 + $0x8] sm:$0xff]  }
  0x12   :  { %v1017_v60 = vld [vmem:[%s1259_s5] sm:$0xff]  }
  0x13   :  { %944 = vmatpush3.bf16.msra.mxu0 %v1006_v11  ;;  %352 = vperm.xlu1 %1001, %v298_v19   ;;  %v1213_v10 = vld [vmem:[%s1260_s4] ss:$0 sm:$0xff] }
  0x14   :  { %945 = vmatprep.subr.bf16.mxu0 %v1007_v14  ;;  %970 = vmatpush3.bf16.msra.mxu1 %v1011_v45 }
  0x15   :  { %347 = vperm.xlu0 %1000, %v297_v18   ;;  %971 = vmatprep.subr.bf16.mxu1 %v1012_v46 }
  0x17   :  { %946 = vmatpush3.bf16.msra.mxu0 %v1007_v14  ;;  %362 = vperm.xlu1 %1001, %v300_v22  }
  0x18   :  { %947 = vmatprep.subr.bf16.mxu0 %v1008_v17  ;;  %972 = vmatpush3.bf16.msra.mxu1 %v1012_v46 }
  0x19   :  { %357 = vperm.xlu0 %1000, %v299_v21   ;;  %973 = vmatprep.subr.bf16.mxu1 %v1013_v50 }
  0x1b   :  { %948 = vmatpush3.bf16.msra.mxu0 %v1008_v17  ;;  %372 = vperm.xlu1 %1001, %v302_v27  }
  0x1c   :  { %949 = vmatprep.subr.bf16.mxu0 %v1009_v20  ;;  %974 = vmatpush3.bf16.msra.mxu1 %v1013_v50 }
  0x1d   :  { %367 = vperm.xlu0 %1000, %v301_v25   ;;  %975 = vmatprep.subr.bf16.mxu1 %v1014_v57 }
  0x1f   :  { %950 = vmatpush3.bf16.msra.mxu0 %v1009_v20  ;;  %382 = vperm.xlu1 %1001, %v304_v29  }
  0x20   :  { %976 = vmatpush3.bf16.msra.mxu1 %v1014_v57 }
  0x21   :  { %377 = vperm.xlu0 %1000, %v303_v28   ;;  %977 = vmatprep.subr.bf16.mxu1 %v1015_v58 }
  0x22   :  { %952 = vmatmul.mubr.bf16.vlgmr.msra.gmra.mxu0 %v86_v24 }
  0x23   :  { %955 = vmatprep.mubr.bf16.mxu0 %v87_v26  ;;  %632 = vperm.xlu1 %1001, %v610_v34  }
  0x24   :  { %978 = vmatpush3.bf16.msra.mxu1 %v1015_v58 }
  0x25   :  { %627 = vperm.xlu0 %1000, %v609_v32   ;;  %979 = vmatprep.subr.bf16.mxu1 %v1016_v59 }
  0x27   :  { %642 = vperm.xlu1 %1001, %v612_v36  }
  0x28   :  { %980 = vmatpush3.bf16.msra.mxu1 %v1016_v59 }
  0x29   :  { %637 = vperm.xlu0 %1000, %v611_v35   ;;  %981 = vmatprep.subr.bf16.mxu1 %v1017_v60 }
  0x2a   :  { %956 = vmatmul.mubr.bf16.gmra.mxu0 %v88_v31 }
  0x2b   :  { %959 = vmatprep.mubr.bf16.mxu0 %v89_v33  ;;  %652 = vperm.xlu1 %1001, %v614_v39  }
  0x2c   :  { %982 = vmatpush3.bf16.msra.mxu1 %v1017_v60 }
  0x2d   :  { %647 = vperm.xlu0 %1000, %v613_v38  }
  0x2f   :  { %662 = vperm.xlu1 %1001, %v616_v44  }
  0x31   :  { %657 = vperm.xlu0 %1000, %v615_v43  }
  0x32   :  { %960 = vmatmul.mubr.bf16.gmra.mxu0 %v90_v40 }
  0x33   :  { %963 = vmatprep.mubr.bf16.mxu0 %v91_v42  ;;  %672 = vperm.xlu1 %1001, %v618_v49  }
  0x35   :  { %667 = vperm.xlu0 %1000, %v617_v48  }
  0x37   :  { %682 = vperm.xlu1 %1001, %v620_v52  }
  0x39   :  { %677 = vperm.xlu0 %1000, %v619_v51  }
  0x3a   :  { %964 = vmatmul.mubr.bf16.gmra.mxu0 %v92_v47 }
  0x3b   :  { %692 = vperm.xlu1 %1001, %v622_v54  }
  0x3d   :  { %687 = vperm.xlu0 %1000, %v621_v53  }
  0x3f   :  { %702 = vperm.xlu1 %1001, %v624_v56  }
  0x41   :  { %697 = vperm.xlu0 %1000, %v623_v55  }
  0x7e   :  { %v318_v62 = vpop.permute.xlu1 %317 }
  0x80   :  { %v308_v61 = vpop.permute.xlu0 %307 }
  0x82   :  { %v323_v0 = vpop.permute.xlu1 %322 }
  0x84   :  { %v313_v63 = vpop.permute.xlu0 %312 }
  0x86   :  { %v333_v2 = vpop.permute.xlu1 %332 }
  0x88   :  { %v328_v1 = vpop.permute.xlu0 %327 }
  0x8a   :  { %v343_v7 = vpop.permute.xlu1 %342 }
  0x8c   :  { %v338_v5 = vpop.permute.xlu0 %337 }
  0x8e   :  { %v353_v20 = vpop.permute.xlu1 %352 }
  0x90   :  { %v348_v18 = vpop.permute.xlu0 %347 }
  0x92   :  { %v363_v37 = vpop.permute.xlu1 %362 }
  0x94   :  { %v358_v33 = vpop.permute.xlu0 %357 }
  0x96   :  { %v373_v52 = vpop.permute.xlu1 %372 }
  0x98   :  { %v368_v49 = vpop.permute.xlu0 %367 }
  0xe2   :  { %v953_v3 = vpop.f32.mrf.mxu0 }
  0xe3   :  { %v387_v8 = vmul.f32 %v953_v3, %v318_v62  ;;  %v383_v3 = vpop.permute.xlu1 %382 }
  0xe4   :  { %v175_v4 = vpop.f32.mrf.mxu0 }
  0xe5   :  { %v385_v6 = vmul.f32 %v308_v61, %v175_v4  ;;  %v410_v16 = vadd.f32 %v1213_v10, %v387_v8 }
  0xe6   :  { %v954_v9 = vpop.f32.mrf.mxu0 }
  0xe7   :  { %v388_v11 = vmul.f32 %v954_v9, %v323_v0  ;;  %v408_v15 = vadd.f32 %v1213_v10, %v385_v6  ;;  %v426_v26 = vmax.f32 %v410_v16, 0.0 }
  0xe8   :  { %v178_v12 = vpop.f32.mrf.mxu0 }
  0xe9   :  { %v411_v13 = vadd.f32 %v1213_v10, %v388_v11  ;;  %v386_v14 = vmul.f32 %v313_v63, %v178_v12  ;;  %v424_v24 = vmax.f32 %v408_v15, 0.0  ;;  %v378_v63 = vpop.permute.xlu0 %377 }
  0xea   :  { %v957_v17 = vpop.f32.mrf.mxu0 }
  0xeb   :  { %v409_v19 = vadd.f32 %v1213_v10, %v386_v14  ;;  %v427_v21 = vmax.f32 %v411_v13, 0.0  ;;  %v391_v27 = vmul.f32 %v957_v17, %v338_v5 }
  0xec   :  { %v191_v22 = vpop.f32.mrf.mxu0 }
  0xed   :  { %v389_v23 = vmul.f32 %v328_v1, %v191_v22  ;;  %v425_v25 = vmax.f32 %v409_v19, 0.0  ;;  %v441_v32 = vpack.c.bf16 %v427_v21, %v426_v26  ;;  %v414_v38 = vadd.f32 %v1213_v10, %v391_v27 }
  0xee   :  { %v958_v28 = vpop.f32.mrf.mxu0 }
  0xef   :  { %v392_v29 = vmul.f32 %v958_v28, %v343_v7  ;;  %v440_v30 = vpack.c.bf16 %v425_v25, %v424_v24  ;;  %v412_v34 = vadd.f32 %v1213_v10, %v389_v23  ;;  %v430_v46 = vmax.f32 %v414_v38, 0.0  ;;  %v628_v23 = vpop.permute.xlu0 %627  ;;  %v633_v24 = vpop.permute.xlu1 %632 }
  0xf0   :  { %v194_v31 = vpop.f32.mrf.mxu0 }
  0xf1   :  { %v415_v35 = vadd.f32 %v1213_v10, %v392_v29  ;;  %v390_v36 = vmul.f32 %v333_v2, %v194_v31  ;;  %983 = vmatprep.mubr.bf16.mxu1 %v440_v30  ;;  %v428_v43 = vmax.f32 %v412_v34, 0.0 }
  0xf2   :  { %v961_v39 = vpop.f32.mrf.mxu0  ;;  %984 = vmatmul.mubr.bf16.vlgmr.msra.gmra.mxu1 %v441_v32 }
  0xf3   :  { %v413_v40 = vadd.f32 %v1213_v10, %v390_v36  ;;  %v431_v41 = vmax.f32 %v415_v35, 0.0  ;;  %v395_v47 = vmul.f32 %v961_v39, %v358_v33  ;;  %v638_v25 = vpop.permute.xlu0 %637  ;;  %v643_v26 = vpop.permute.xlu1 %642 }
  0xf4   :  { %v207_v42 = vpop.f32.mrf.mxu0 }
  0xf5   :  { %v429_v44 = vmax.f32 %v413_v40, 0.0  ;;  %v393_v45 = vmul.f32 %v348_v18, %v207_v42  ;;  %v443_v54 = vpack.c.bf16 %v431_v41, %v430_v46  ;;  %v418_v58 = vadd.f32 %v1213_v10, %v395_v47 }
  0xf6   :  { %v962_v48 = vpop.f32.mrf.mxu0 }
  0xf7   :  { %v396_v50 = vmul.f32 %v962_v48, %v363_v37  ;;  %v442_v51 = vpack.c.bf16 %v429_v44, %v428_v43  ;;  %v416_v55 = vadd.f32 %v1213_v10, %v393_v45  ;;  %v434_v4 = vmax.f32 %v418_v58, 0.0  ;;  %v648_v27 = vpop.permute.xlu0 %647  ;;  %v653_v28 = vpop.permute.xlu1 %652 }
  0xf8   :  { %v210_v53 = vpop.f32.mrf.mxu0 }
  0xf9   :  { %v419_v56 = vadd.f32 %v1213_v10, %v396_v50  ;;  %v394_v57 = vmul.f32 %v353_v20, %v210_v53  ;;  %987 = vmatprep.mubr.bf16.mxu1 %v442_v51  ;;  %v432_v0 = vmax.f32 %v416_v55, 0.0 }
  0xfa   :  { %v965_v59 = vpop.f32.mrf.mxu0  ;;  %988 = vmatmul.mubr.bf16.gmra.mxu1 %v443_v54 }
  0xfb   :  { %v417_v60 = vadd.f32 %v1213_v10, %v394_v57  ;;  %v435_v61 = vmax.f32 %v419_v56, 0.0  ;;  %v399_v5 = vmul.f32 %v965_v59, %v378_v63  ;;  %v658_v31 = vpop.permute.xlu0 %657  ;;  %v663_v32 = vpop.permute.xlu1 %662 }
  0xfc   :  { %v223_v62 = vpop.f32.mrf.mxu0 }
  0xfd   :  { %v433_v1 = vmax.f32 %v417_v60, 0.0  ;;  %v397_v2 = vmul.f32 %v368_v49, %v223_v62  ;;  %v445_v11 = vpack.c.bf16 %v435_v61, %v434_v4  ;;  %v422_v15 = vadd.f32 %v1213_v10, %v399_v5 }
  0xfe   :  { %v966_v6 = vpop.f32.mrf.mxu0 }
  0xff   :  { %v400_v7 = vmul.f32 %v966_v6, %v383_v3  ;;  %v444_v8 = vpack.c.bf16 %v433_v1, %v432_v0  ;;  %v420_v12 = vadd.f32 %v1213_v10, %v397_v2  ;;  %v438_v20 = vmax.f32 %v422_v15, 0.0  ;;  %v668_v40 = vpop.permute.xlu0 %667  ;;  %v673_v42 = vpop.permute.xlu1 %672 }
 0x100   :  { %v226_v9 = vpop.f32.mrf.mxu0 }
 0x101   :  { %v423_v13 = vadd.f32 %v1213_v10, %v400_v7  ;;  %v398_v14 = vmul.f32 %v373_v52, %v226_v9  ;;  %991 = vmatprep.mubr.bf16.mxu1 %v444_v8  ;;  %v436_v18 = vmax.f32 %v420_v12, 0.0 }
 0x102   :  { %992 = vmatmul.mubr.bf16.gmra.mxu1 %v445_v11 }
 0x103   :  { %v421_v16 = vadd.f32 %v1213_v10, %v398_v14  ;;  %v439_v17 = vmax.f32 %v423_v13, 0.0  ;;  %v678_v48 = vpop.permute.xlu0 %677  ;;  %v683_v52 = vpop.permute.xlu1 %682 }
 0x105   :  { %v437_v19 = vmax.f32 %v421_v16, 0.0  ;;  %v447_v22 = vpack.c.bf16 %v439_v17, %v438_v20 }
 0x107   :  { %v446_v21 = vpack.c.bf16 %v437_v19, %v436_v18  ;;  %v688_v57 = vpop.permute.xlu0 %687  ;;  %v693_v60 = vpop.permute.xlu1 %692 }
 0x109   :  { %995 = vmatprep.mubr.bf16.mxu1 %v446_v21 }
 0x10a   :  { %996 = vmatmul.mubr.bf16.gmra.mxu1 %v447_v22 }
 0x10b   :  { %v698_v4 = vpop.permute.xlu0 %697  ;;  %v703_v5 = vpop.permute.xlu1 %702 }
 0x1b2   :  { %v985_v29 = vpop.f32.mrf.mxu1 }
 0x1b3   :  { %v707_v10 = vmul.f32 %v985_v29, %v638_v25 }
 0x1b4   :  { %v546_v30 = vpop.f32.mrf.mxu1 }
 0x1b5   :  { %v705_v36 = vmul.f32 %v628_v23, %v546_v30 }
 0x1b6   :  { %v986_v33 = vpop.f32.mrf.mxu1 }
 0x1b7   :  { %v708_v34 = vmul.f32 %v986_v33, %v643_v26 }
 0x1b8   :  { %v549_v35 = vpop.f32.mrf.mxu1 }
 0x1b9   :  { %v864_v37 = vpack.c.bf16 %v708_v34, %v707_v10  ;;  %v706_v38 = vmul.f32 %v633_v24, %v549_v35 }
 0x1ba   :  { %v989_v39 = vpop.f32.mrf.mxu1 }
 0x1bb   :  { %896 = vst [vmem:[%s1261_s6 + $0x8] sm:$0xff] %v864_v37   ;;  %v859_v41 = vpack.c.bf16 %v706_v38, %v705_v36  ;;  %v711_v45 = vmul.f32 %v989_v39, %v658_v31 }
 0x1bc   :  { %v562_v43 = vpop.f32.mrf.mxu1 }
 0x1bd   :  { %860 = vst [vmem:[%s1261_s6] sm:$0xff] %v859_v41   ;;  %v709_v49 = vmul.f32 %v648_v27, %v562_v43 }
 0x1be   :  { %v990_v44 = vpop.f32.mrf.mxu1 }
 0x1bf   :  { %v712_v46 = vmul.f32 %v990_v44, %v663_v32 }
 0x1c0   :  { %v565_v47 = vpop.f32.mrf.mxu1 }
 0x1c1   :  { %v874_v50 = vpack.c.bf16 %v712_v46, %v711_v45  ;;  %v710_v51 = vmul.f32 %v653_v28, %v565_v47 }
 0x1c2   :  { %v993_v53 = vpop.f32.mrf.mxu1 }
 0x1c3   :  { %898 = vst [vmem:[%s1261_s6 + $0x18] sm:$0xff] %v874_v50   ;;  %v869_v54 = vpack.c.bf16 %v710_v51, %v709_v49  ;;  %v715_v58 = vmul.f32 %v993_v53, %v678_v48 }
 0x1c4   :  { %v578_v55 = vpop.f32.mrf.mxu1 }
 0x1c5   :  { %897 = vst [vmem:[%s1261_s6 + $0x10] sm:$0xff] %v869_v54   ;;  %v713_v62 = vmul.f32 %v668_v40, %v578_v55 }
 0x1c6   :  { %v994_v56 = vpop.f32.mrf.mxu1 }
 0x1c7   :  { %v716_v59 = vmul.f32 %v994_v56, %v683_v52 }
 0x1c8   :  { %v581_v61 = vpop.f32.mrf.mxu1 }
 0x1c9   :  { %v884_v63 = vpack.c.bf16 %v716_v59, %v715_v58  ;;  %v714_v0 = vmul.f32 %v673_v42, %v581_v61 }
 0x1ca   :  { %v997_v1 = vpop.f32.mrf.mxu1 }
 0x1cb   :  { %900 = vst [vmem:[%s1261_s6 + $0x28] sm:$0xff] %v884_v63   ;;  %v879_v2 = vpack.c.bf16 %v714_v0, %v713_v62  ;;  %v719_v7 = vmul.f32 %v997_v1, %v698_v4 }
 0x1cc   :  { %v594_v3 = vpop.f32.mrf.mxu1 }
 0x1cd   :  { %899 = vst [vmem:[%s1261_s6 + $0x20] sm:$0xff] %v879_v2   ;;  %v717_v11 = vmul.f32 %v688_v57, %v594_v3 }
 0x1ce   :  { %v998_v6 = vpop.f32.mrf.mxu1 }
 0x1cf   :  { %v720_v8 = vmul.f32 %v998_v6, %v703_v5 }
 0x1d0   :  { %v597_v9 = vpop.f32.mrf.mxu1 }
 0x1d1   :  { %v894_v12 = vpack.c.bf16 %v720_v8, %v719_v7  ;;  %v718_v13 = vmul.f32 %v693_v60, %v597_v9 }
 0x1d3   :  { %902 = vst [vmem:[%s1261_s6 + $0x38] sm:$0xff] %v894_v12   ;;  %v889_v14 = vpack.c.bf16 %v718_v13, %v717_v11 }
 0x1d5   :  { %901 = vst [vmem:[%s1261_s6 + $0x30] sm:$0xff] %v889_v14  }

</bundles_post_ra>
